<compile_context>
chip_gen: v5e
topology: v5e:2x2
jax: 0.10.0
libtpu: 0.0.40
codegen_flags: <defaults>
</compile_context>

<pallas_src>
import functools

import jax
import jax.numpy as jnp
from jax import lax
from jax.experimental import pallas as pl
from jax.experimental.pallas import tpu as pltpu

LANE = 128
_CHUNK = 512          # rows (of 128 pixels) processed per inner iteration


def _jaccard_counts_kernel(preds_ref, target_ref, counts_ref, *,
                           num_classes, rows_total, sub_rows, chunk, n_chunks,
                           ragged_rows):
    """One (batch, pixel-block) grid step.

    preds_ref:  (C, S, 128) float logits
    target_ref: (S, 128)    integer labels (any int dtype, widened in-register)
    counts_ref: (3C, 8, 128) float32 per-lane partial counts for this step,
                rows ordered [inter_0..inter_{C-1}, psum_0.., tsum_0..].
    """
    j = pl.program_id(1)

    counts_ref[...] = jnp.zeros_like(counts_ref)

    use_mxu = chunk >= 8
    # Ones operand for the MXU sublane reduction (hoisted out of the chunk loop).
    ones_mxu = jnp.ones((8, chunk), jnp.bfloat16) if use_mxu else None

    def accum(row_idx, mask):
        if use_mxu:
            # Sublane reduction on the (otherwise idle) MXU; all 8 result rows
            # are identical column sums, the epilogue reads row 0.
            counts_ref[row_idx] += jnp.dot(ones_mxu, mask.astype(jnp.bfloat16),
                                           preferred_element_type=jnp.float32)
        else:
            counts_ref[row_idx, 0:1, :] += jnp.sum(
                mask.astype(jnp.float32), axis=0, keepdims=True)

    def process_rows(start, masked):
        # start: chunk-aligned row offset within the block (static or traced).
        tgt = target_ref[pl.ds(start, chunk), :].astype(jnp.int32)

        # Unrolled first-max argmax over the (small) class dim -- VPU work on
        # lane-dense (chunk, 128) tiles.  Widen to f32 (no bf16 VPU on v5e).
        best = preds_ref[0, pl.ds(start, chunk), :].astype(jnp.float32)
        pred_cls = jnp.zeros((chunk, LANE), jnp.int32)
        for c in range(1, num_classes):
            cand = preds_ref[c, pl.ds(start, chunk), :].astype(jnp.float32)
            take = cand > best                      # strict >  => first-max tie-break
            best = jnp.where(take, cand, best)
            pred_cls = jnp.where(take, jnp.int32(c), pred_cls)

        if masked:
            # Only the final (partial) pixel block runs this path: rows past
            # `rows_total` were read past the array end (garbage) -> sentinel.
            row = lax.broadcasted_iota(jnp.int32, (chunk, LANE), 0)
            valid = (row + (j * sub_rows + start)) < rows_total
            sentinel = jnp.int32(num_classes)       # never counted
            pred_cls = jnp.where(valid, pred_cls, sentinel)
            tgt = jnp.where(valid, tgt, sentinel)

        for c in range(num_classes):
            p_b = pred_cls == c
            t_b = tgt == c
            i_b = jnp.logical_and(p_b, t_b)
            accum(c, i_b)
            if c < num_classes - 1:
                # Last-class pred count is derived in the epilogue.
                accum(num_classes + c, p_b)
            accum(2 * num_classes + c, t_b)

    def run(masked):
        if n_chunks == 1:
            process_rows(0, masked)
        else:
            def body(ci, carry):
                process_rows(pl.multiple_of(ci * chunk, chunk), masked)
                return carry
            lax.fori_loop(0, n_chunks, body, 0)

    if ragged_rows:
        last = pl.num_programs(1) - 1

        @pl.when(j != last)
        def _steady():
            run(False)

        @pl.when(j == last)
        def _last():
            run(True)
    else:
        run(False)


def _pick_row_tile(num_classes, preds_itemsize, tgt_itemsize):
    """Rows (of 128 pixels) per grid step: ~20 MiB of double-buffered input."""
    budget = 20 * 1024 * 1024
    bytes_per_row = LANE * (num_classes * preds_itemsize + tgt_itemsize) * 2
    s = budget // bytes_per_row
    # TODO(synk): on v5e/v6e (128 MiB VMEM) a ~2x larger budget buys ~1-3% more.
    return int(max(_CHUNK, (s // _CHUNK) * _CHUNK))


def jaccard_loss(preds, target, num_classes=4, as_loss=True):
    """preds: (N, C, H, W) float logits; target: (N, H, W) int. Returns scalar."""
    N, C, H, W = preds.shape
    assert C == num_classes
    HW = H * W
    R = HW // LANE                    # full 128-pixel lane groups
    tail = HW - R * LANE              # leftover (<128) pixels per image

    preds_flat = preds.reshape(N, C, HW)      # free reshapes, no NCHW transpose
    target_flat = target.reshape(N, HW)

    inter = jnp.zeros((num_classes,), jnp.float32)
    psum = jnp.zeros((num_classes,), jnp.float32)
    tsum = jnp.zeros((num_classes,), jnp.float32)

    if R > 0:
        if tail == 0:
            # Aligned: pure views, zero extra HBM traffic.  Target streams in
            # its own dtype (int8 callers get the 1 B/pixel rate for free; a
            # standalone int32->int8 convert would only ADD traffic, so skip).
            preds_main = preds_flat.reshape(N, C, R, LANE)
            target_main = target_flat.reshape(N, R, LANE)
        else:
            # Ragged: kernel covers the 128-aligned prefix.  The prefix is a
            # strided region so one bounded copy is unavoidable here; fold the
            # int8 narrowing of the target into that same copy.
            # TODO(synk): a fully copy-free ragged path needs manual DMA from
            # the flat (N, C, HW) layout (memory_space=pl.ANY) instead of
            # BlockSpec tiling.
            tgt_dt = jnp.int8 if num_classes <= 127 else jnp.int32
            preds_main = preds_flat[:, :, :R * LANE].reshape(N, C, R, LANE)
            target_main = (target_flat[:, :R * LANE]
                           .astype(tgt_dt).reshape(N, R, LANE))

        # Row tiling: S rows of 128 pixels per grid step, processed in
        # _CHUNK-row chunks so temporaries stay a handful of vregs.
        if R <= _CHUNK:
            S, chunk = R, R
        else:
            s_cap = _pick_row_tile(num_classes, preds_main.dtype.itemsize,
                                   target_main.dtype.itemsize)
            S = min(s_cap, (R // _CHUNK) * _CHUNK)
            chunk = _CHUNK
        n_chunks = S // chunk
        grid_pix = pl.cdiv(R, S)
        ragged_rows = (R % S) != 0

        kernel = functools.partial(
            _jaccard_counts_kernel,
            num_classes=num_classes, rows_total=R, sub_rows=S, chunk=chunk,
            n_chunks=n_chunks, ragged_rows=ragged_rows)

        counts = pl.pallas_call(
            kernel,
            out_shape=jax.ShapeDtypeStruct(
                (N, grid_pix, 3 * num_classes, 8, LANE), jnp.float32),
            grid_spec=pltpu.PrefetchScalarGridSpec(
                num_scalar_prefetch=0,
                grid=(N, grid_pix),
                in_specs=[
                    pl.BlockSpec((None, num_classes, S, LANE),
                                 lambda n, j: (n, 0, j, 0)),
                    pl.BlockSpec((None, S, LANE),
                                 lambda n, j: (n, j, 0)),
                ],
                out_specs=pl.BlockSpec(
                    (None, None, 3 * num_classes, 8, LANE),
                    lambda n, j: (n, j, 0, 0, 0)),
            ),
            compiler_params=pltpu.CompilerParams(
                # Per-(batch, pixel-block) partial counts -> both axes are
                # parallel, so a 2-TC chip (v7x) stays busy even at N == 1.
                dimension_semantics=("parallel", "parallel"),
                vmem_limit_bytes=40 * 1024 * 1024,
            ),
        )(preds_main, target_main)

        # Tiny epilogue: the 8 MXU result rows are identical -> take row 0,
        # reduce over (batch, pixel-block, lane).  Partials are exact integers
        # in f32; rounding can only appear above ~2^24 pixels per class.
        lane_counts = counts[:, :, :, 0, :]                      # (N, GJ, 3C, 128)
        totals = jnp.sum(lane_counts, axis=(0, 1, 3))            # (3C,)
        inter = totals[:num_classes]
        psum = totals[num_classes:2 * num_classes]
        tsum = totals[2 * num_classes:]
        # Last-class pred count was skipped in-kernel: every prefix pixel gets
        # exactly one predicted class, so derive it from the pixel total.
        kernel_px = jnp.float32(N * R * LANE)
        psum = psum.at[num_classes - 1].set(
            kernel_px - jnp.sum(psum[:num_classes - 1]))

    if tail > 0:
        # Exact tail (< 128 pixels per image) in plain JAX -- no padding or
        # full-tensor copies.
        cls = jnp.arange(num_classes, dtype=jnp.int32)
        p_tail = jnp.argmax(preds_flat[:, :, R * LANE:], axis=1)     # (N, tail)
        t_tail = target_flat[:, R * LANE:].astype(jnp.int32)
        p_oh = p_tail[..., None] == cls
        t_oh = t_tail[..., None] == cls
        inter = inter + jnp.sum(p_oh & t_oh, axis=(0, 1)).astype(jnp.float32)
        psum = psum + jnp.sum(p_oh, axis=(0, 1)).astype(jnp.float32)
        tsum = tsum + jnp.sum(t_oh, axis=(0, 1)).astype(jnp.float32)

    union = psum + tsum - inter
    iou = jnp.where(union > 0, inter / jnp.maximum(union, 1.0), 0.0)  # absent_score = 0
    jac = jnp.sum(iou) / jnp.float32(num_classes)
    return 1.0 - jac if as_loss else jac


def _jaccard_ref(preds, target, num_classes=4, as_loss=True):
    """Pure-JAX reference with identical semantics (for correctness check)."""
    pred_cls = jnp.argmax(preds, axis=1)          # (N, H, W)
    p = pred_cls.reshape(-1)
    t = target.reshape(-1)
    cls = jnp.arange(num_classes)
    pred_oh = (p[:, None] == cls[None, :]).astype(jnp.float32)
    tgt_oh = (t[:, None] == cls[None, :]).astype(jnp.float32)
    inter = jnp.sum(pred_oh * tgt_oh, axis=0)
    union = jnp.sum(pred_oh, axis=0) + jnp.sum(tgt_oh, axis=0) - inter
    iou = jnp.where(union > 0, inter / jnp.maximum(union, 1.0), 0.0)
    jac = jnp.sum(iou) / num_classes
    return 1.0 - jac if as_loss else jac


if __name__ == "__main__":
    key = jax.random.PRNGKey(0)
    k1, k2, k3, k4, k5, k6 = jax.random.split(key, 6)
    C = 4

    # 1) Primary check: small aligned shape (H*W % 128 == 0) -- zero-copy path.
    N, H, W = 2, 16, 16
    preds = jax.random.normal(k1, (N, C, H, W), dtype=jnp.float32)
    target = jax.random.randint(k2, (N, H, W), 0, C, dtype=jnp.int32)
    loss = jax.block_until_ready(jaccard_loss(preds, target, num_classes=C, as_loss=True))
    ref = _jaccard_ref(preds, target, num_classes=C, as_loss=True)
    assert jnp.allclose(loss, ref, atol=1e-5), (loss, ref)

    # 2) Ragged spatial size: exercises the prefix slice + int8 target + JAX tail.
    H2 = W2 = 20
    preds2 = jax.random.normal(k3, (N, C, H2, W2), dtype=jnp.float32)
    target2 = jax.random.randint(k4, (N, H2, W2), 0, C, dtype=jnp.int32)
    loss2 = jax.block_until_ready(jaccard_loss(preds2, target2, num_classes=C, as_loss=True))
    ref2 = _jaccard_ref(preds2, target2, num_classes=C, as_loss=True)
    assert jnp.allclose(loss2, ref2, atol=1e-5), (loss2, ref2)

    # 3) Multi-block grid: exercises the chunk loop, the MXU count path and the
    #    pl.when-gated masked final pixel block (1152 lane-rows, S=1024).
    H3 = W3 = 384
    preds3 = jax.random.normal(k5, (1, C, H3, W3), dtype=jnp.float32)
    target3 = jax.random.randint(k6, (1, H3, W3), 0, C, dtype=jnp.int32)
    loss3 = jax.block_until_ready(jaccard_loss(preds3, target3, num_classes=C, as_loss=True))
    ref3 = _jaccard_ref(preds3, target3, num_classes=C, as_loss=True)
    assert jnp.allclose(loss3, ref3, atol=1e-5), (loss3, ref3)

    print("KERNEL_OK")
</pallas_src>

<mosaic_0001>
module attributes {stable_mosaic.version = 11 : i64} {
  func.func @_jaccard_counts_kernel(%arg0: i32, %arg1: i32, %arg2: memref<1x4x2x128xf32, #tpu.memory_space<vmem>>, %arg3: memref<1x2x128xi32, #tpu.memory_space<vmem>>, %arg4: memref<1x1x12x8x128xf32, #tpu.memory_space<vmem>>) attributes {dimension_semantics = [#tpu.dimension_semantics<parallel>, #tpu.dimension_semantics<parallel>], iteration_bounds = array<i64: 2, 1>, scalar_prefetch = 0 : i64, scratch_operands = 0 : i64, tpu.core_type = #tpu.core_type<tc>, window_params = [{transform_indices = @transform_0, window_bounds = array<i64: 1, 4, 2, 128>}, {transform_indices = @transform_1, window_bounds = array<i64: 1, 2, 128>}, {transform_indices = @transform_2, window_bounds = array<i64: 1, 1, 12, 8, 128>}]} {
    %cst = arith.constant 0.000000e+00 : f32
    %0 = vector.broadcast %cst : f32 to vector<12x8x128xf32>
    %c0 = arith.constant 0 : index
    %c0_0 = arith.constant 0 : index
    %c0_1 = arith.constant 0 : index
    %c0_2 = arith.constant 0 : index
    %c0_3 = arith.constant 0 : index
    %1 = vector.load %arg4[%c0, %c0_0, %c0_1, %c0_2, %c0_3] : memref<1x1x12x8x128xf32, #tpu.memory_space<vmem>>, vector<1x1x12x8x128xf32>
    %2 = vector.shape_cast %1 : vector<1x1x12x8x128xf32> to vector<12x8x128xf32>
    %3 = vector.shape_cast %0 : vector<12x8x128xf32> to vector<1x1x12x8x128xf32>
    tpu.vector_store %arg4[%c0, %c0_0, %c0_1, %c0_2, %c0_3], %3 {strides = array<i32>} : memref<1x1x12x8x128xf32, #tpu.memory_space<vmem>>, vector<1x1x12x8x128xf32>,
    %c0_4 = arith.constant 0 : index
    %c0_5 = arith.constant 0 : index
    %c0_6 = arith.constant 0 : index
    %4 = vector.load %arg3[%c0_4, %c0_5, %c0_6] : memref<1x2x128xi32, #tpu.memory_space<vmem>>, vector<1x2x128xi32>
    %5 = vector.shape_cast %4 : vector<1x2x128xi32> to vector<2x128xi32>
    %c0_7 = arith.constant 0 : index
    %c0_8 = arith.constant 0 : index
    %c0_9 = arith.constant 0 : index
    %c0_10 = arith.constant 0 : index
    %6 = vector.load %arg2[%c0_7, %c0_8, %c0_9, %c0_10] : memref<1x4x2x128xf32, #tpu.memory_space<vmem>>, vector<1x1x2x128xf32>
    %7 = vector.shape_cast %6 : vector<1x1x2x128xf32> to vector<2x128xf32>
    %c0_i32 = arith.constant 0 : i32
    %8 = vector.broadcast %c0_i32 : i32 to vector<2x128xi32>
    %c0_11 = arith.constant 0 : index
    %c1 = arith.constant 1 : index
    %c0_12 = arith.constant 0 : index
    %c0_13 = arith.constant 0 : index
    %9 = vector.load %arg2[%c0_11, %c1, %c0_12, %c0_13] : memref<1x4x2x128xf32, #tpu.memory_space<vmem>>, vector<1x1x2x128xf32>
    %10 = vector.shape_cast %9 : vector<1x1x2x128xf32> to vector<2x128xf32>
    %11 = arith.cmpf ogt, %10, %7 : vector<2x128xf32>
    %12 = arith.select %11, %10, %7 : vector<2x128xi1>, vector<2x128xf32>
    %c1_i32 = arith.constant 1 : i32
    %13 = vector.broadcast %c1_i32 : i32 to vector<2x128xi32>
    %14 = arith.select %11, %13, %8 : vector<2x128xi1>, vector<2x128xi32>
    %c0_14 = arith.constant 0 : index
    %c2 = arith.constant 2 : index
    %c0_15 = arith.constant 0 : index
    %c0_16 = arith.constant 0 : index
    %15 = vector.load %arg2[%c0_14, %c2, %c0_15, %c0_16] : memref<1x4x2x128xf32, #tpu.memory_space<vmem>>, vector<1x1x2x128xf32>
    %16 = vector.shape_cast %15 : vector<1x1x2x128xf32> to vector<2x128xf32>
    %17 = arith.cmpf ogt, %16, %12 : vector<2x128xf32>
    %18 = arith.select %17, %16, %12 : vector<2x128xi1>, vector<2x128xf32>
    %c2_i32 = arith.constant 2 : i32
    %19 = vector.broadcast %c2_i32 : i32 to vector<2x128xi32>
    %20 = arith.select %17, %19, %14 : vector<2x128xi1>, vector<2x128xi32>
    %c0_17 = arith.constant 0 : index
    %c3 = arith.constant 3 : index
    %c0_18 = arith.constant 0 : index
    %c0_19 = arith.constant 0 : index
    %21 = vector.load %arg2[%c0_17, %c3, %c0_18, %c0_19] : memref<1x4x2x128xf32, #tpu.memory_space<vmem>>, vector<1x1x2x128xf32>
    %22 = vector.shape_cast %21 : vector<1x1x2x128xf32> to vector<2x128xf32>
    %23 = arith.cmpf ogt, %22, %18 : vector<2x128xf32>
    %c3_i32 = arith.constant 3 : i32
    %24 = vector.broadcast %c3_i32 : i32 to vector<2x128xi32>
    %25 = arith.select %23, %24, %20 : vector<2x128xi1>, vector<2x128xi32>
    %c0_i32_20 = arith.constant 0 : i32
    %26 = vector.broadcast %c0_i32_20 : i32 to vector<2x128xi32>
    %27 = arith.cmpi eq, %25, %26 : vector<2x128xi32>
    %c0_i32_21 = arith.constant 0 : i32
    %28 = vector.broadcast %c0_i32_21 : i32 to vector<2x128xi32>
    %29 = arith.cmpi eq, %5, %28 : vector<2x128xi32>
    %30 = arith.andi %27, %29 : vector<2x128xi1>
    %c0_22 = arith.constant 0 : index
    %c0_23 = arith.constant 0 : index
    %c0_24 = arith.constant 0 : index
    %c0_25 = arith.constant 0 : index
    %c0_26 = arith.constant 0 : index
    %31 = vector.load %arg4[%c0_22, %c0_23, %c0_24, %c0_25, %c0_26] : memref<1x1x12x8x128xf32, #tpu.memory_space<vmem>>, vector<1x1x1x1x128xf32>
    %32 = vector.shape_cast %31 : vector<1x1x1x1x128xf32> to vector<1x128xf32>
    %33 = arith.extui %30 : vector<2x128xi1> to vector<2x128xi32>
    %34 = arith.sitofp %33 : vector<2x128xi32> to vector<2x128xf32>
    %cst_27 = arith.constant dense<0.000000e+00> : vector<128xf32>
    %35 = vector.multi_reduction <add>, %34, %cst_27 [0] : vector<2x128xf32> to vector<128xf32>
    %36 = vector.shape_cast %35 : vector<128xf32> to vector<1x128xf32>
    %37 = arith.addf %32, %36 : vector<1x128xf32>
    %c0_28 = arith.constant 0 : index
    %c0_29 = arith.constant 0 : index
    %c0_30 = arith.constant 0 : index
    %c0_31 = arith.constant 0 : index
    %c0_32 = arith.constant 0 : index
    %38 = vector.load %arg4[%c0_28, %c0_29, %c0_30, %c0_31, %c0_32] : memref<1x1x12x8x128xf32, #tpu.memory_space<vmem>>, vector<1x1x1x1x128xf32>
    %39 = vector.shape_cast %38 : vector<1x1x1x1x128xf32> to vector<1x128xf32>
    %40 = vector.shape_cast %37 : vector<1x128xf32> to vector<1x1x1x1x128xf32>
    tpu.vector_store %arg4[%c0_28, %c0_29, %c0_30, %c0_31, %c0_32], %40 {strides = array<i32>} : memref<1x1x12x8x128xf32, #tpu.memory_space<vmem>>, vector<1x1x1x1x128xf32>,
    %c0_33 = arith.constant 0 : index
    %c0_34 = arith.constant 0 : index
    %c4 = arith.constant 4 : index
    %c0_35 = arith.constant 0 : index
    %c0_36 = arith.constant 0 : index
    %41 = vector.load %arg4[%c0_33, %c0_34, %c4, %c0_35, %c0_36] : memref<1x1x12x8x128xf32, #tpu.memory_space<vmem>>, vector<1x1x1x1x128xf32>
    %42 = vector.shape_cast %41 : vector<1x1x1x1x128xf32> to vector<1x128xf32>
    %43 = arith.extui %27 : vector<2x128xi1> to vector<2x128xi32>
    %44 = arith.sitofp %43 : vector<2x128xi32> to vector<2x128xf32>
    %cst_37 = arith.constant dense<0.000000e+00> : vector<128xf32>
    %45 = vector.multi_reduction <add>, %44, %cst_37 [0] : vector<2x128xf32> to vector<128xf32>
    %46 = vector.shape_cast %45 : vector<128xf32> to vector<1x128xf32>
    %47 = arith.addf %42, %46 : vector<1x128xf32>
    %c0_38 = arith.constant 0 : index
    %c0_39 = arith.constant 0 : index
    %c4_40 = arith.constant 4 : index
    %c0_41 = arith.constant 0 : index
    %c0_42 = arith.constant 0 : index
    %48 = vector.load %arg4[%c0_38, %c0_39, %c4_40, %c0_41, %c0_42] : memref<1x1x12x8x128xf32, #tpu.memory_space<vmem>>, vector<1x1x1x1x128xf32>
    %49 = vector.shape_cast %48 : vector<1x1x1x1x128xf32> to vector<1x128xf32>
    %50 = vector.shape_cast %47 : vector<1x128xf32> to vector<1x1x1x1x128xf32>
    tpu.vector_store %arg4[%c0_38, %c0_39, %c4_40, %c0_41, %c0_42], %50 {strides = array<i32>} : memref<1x1x12x8x128xf32, #tpu.memory_space<vmem>>, vector<1x1x1x1x128xf32>,
    %c0_43 = arith.constant 0 : index
    %c0_44 = arith.constant 0 : index
    %c8 = arith.constant 8 : index
    %c0_45 = arith.constant 0 : index
    %c0_46 = arith.constant 0 : index
    %51 = vector.load %arg4[%c0_43, %c0_44, %c8, %c0_45, %c0_46] : memref<1x1x12x8x128xf32, #tpu.memory_space<vmem>>, vector<1x1x1x1x128xf32>
    %52 = vector.shape_cast %51 : vector<1x1x1x1x128xf32> to vector<1x128xf32>
    %53 = arith.extui %29 : vector<2x128xi1> to vector<2x128xi32>
    %54 = arith.sitofp %53 : vector<2x128xi32> to vector<2x128xf32>
    %cst_47 = arith.constant dense<0.000000e+00> : vector<128xf32>
    %55 = vector.multi_reduction <add>, %54, %cst_47 [0] : vector<2x128xf32> to vector<128xf32>
    %56 = vector.shape_cast %55 : vector<128xf32> to vector<1x128xf32>
    %57 = arith.addf %52, %56 : vector<1x128xf32>
    %c0_48 = arith.constant 0 : index
    %c0_49 = arith.constant 0 : index
    %c8_50 = arith.constant 8 : index
    %c0_51 = arith.constant 0 : index
    %c0_52 = arith.constant 0 : index
    %58 = vector.load %arg4[%c0_48, %c0_49, %c8_50, %c0_51, %c0_52] : memref<1x1x12x8x128xf32, #tpu.memory_space<vmem>>, vector<1x1x1x1x128xf32>
    %59 = vector.shape_cast %58 : vector<1x1x1x1x128xf32> to vector<1x128xf32>
    %60 = vector.shape_cast %57 : vector<1x128xf32> to vector<1x1x1x1x128xf32>
    tpu.vector_store %arg4[%c0_48, %c0_49, %c8_50, %c0_51, %c0_52], %60 {strides = array<i32>} : memref<1x1x12x8x128xf32, #tpu.memory_space<vmem>>, vector<1x1x1x1x128xf32>,
    %c1_i32_53 = arith.constant 1 : i32
    %61 = vector.broadcast %c1_i32_53 : i32 to vector<2x128xi32>
    %62 = arith.cmpi eq, %25, %61 : vector<2x128xi32>
    %c1_i32_54 = arith.constant 1 : i32
    %63 = vector.broadcast %c1_i32_54 : i32 to vector<2x128xi32>
    %64 = arith.cmpi eq, %5, %63 : vector<2x128xi32>
    %65 = arith.andi %62, %64 : vector<2x128xi1>
    %c0_55 = arith.constant 0 : index
    %c0_56 = arith.constant 0 : index
    %c1_57 = arith.constant 1 : index
    %c0_58 = arith.constant 0 : index
    %c0_59 = arith.constant 0 : index
    %66 = vector.load %arg4[%c0_55, %c0_56, %c1_57, %c0_58, %c0_59] : memref<1x1x12x8x128xf32, #tpu.memory_space<vmem>>, vector<1x1x1x1x128xf32>
    %67 = vector.shape_cast %66 : vector<1x1x1x1x128xf32> to vector<1x128xf32>
    %68 = arith.extui %65 : vector<2x128xi1> to vector<2x128xi32>
    %69 = arith.sitofp %68 : vector<2x128xi32> to vector<2x128xf32>
    %cst_60 = arith.constant dense<0.000000e+00> : vector<128xf32>
    %70 = vector.multi_reduction <add>, %69, %cst_60 [0] : vector<2x128xf32> to vector<128xf32>
    %71 = vector.shape_cast %70 : vector<128xf32> to vector<1x128xf32>
    %72 = arith.addf %67, %71 : vector<1x128xf32>
    %c0_61 = arith.constant 0 : index
    %c0_62 = arith.constant 0 : index
    %c1_63 = arith.constant 1 : index
    %c0_64 = arith.constant 0 : index
    %c0_65 = arith.constant 0 : index
    %73 = vector.load %arg4[%c0_61, %c0_62, %c1_63, %c0_64, %c0_65] : memref<1x1x12x8x128xf32, #tpu.memory_space<vmem>>, vector<1x1x1x1x128xf32>
    %74 = vector.shape_cast %73 : vector<1x1x1x1x128xf32> to vector<1x128xf32>
    %75 = vector.shape_cast %72 : vector<1x128xf32> to vector<1x1x1x1x128xf32>
    tpu.vector_store %arg4[%c0_61, %c0_62, %c1_63, %c0_64, %c0_65], %75 {strides = array<i32>} : memref<1x1x12x8x128xf32, #tpu.memory_space<vmem>>, vector<1x1x1x1x128xf32>,
    %c0_66 = arith.constant 0 : index
    %c0_67 = arith.constant 0 : index
    %c5 = arith.constant 5 : index
    %c0_68 = arith.constant 0 : index
    %c0_69 = arith.constant 0 : index
    %76 = vector.load %arg4[%c0_66, %c0_67, %c5, %c0_68, %c0_69] : memref<1x1x12x8x128xf32, #tpu.memory_space<vmem>>, vector<1x1x1x1x128xf32>
    %77 = vector.shape_cast %76 : vector<1x1x1x1x128xf32> to vector<1x128xf32>
    %78 = arith.extui %62 : vector<2x128xi1> to vector<2x128xi32>
    %79 = arith.sitofp %78 : vector<2x128xi32> to vector<2x128xf32>
    %cst_70 = arith.constant dense<0.000000e+00> : vector<128xf32>
    %80 = vector.multi_reduction <add>, %79, %cst_70 [0] : vector<2x128xf32> to vector<128xf32>
    %81 = vector.shape_cast %80 : vector<128xf32> to vector<1x128xf32>
    %82 = arith.addf %77, %81 : vector<1x128xf32>
    %c0_71 = arith.constant 0 : index
    %c0_72 = arith.constant 0 : index
    %c5_73 = arith.constant 5 : index
    %c0_74 = arith.constant 0 : index
    %c0_75 = arith.constant 0 : index
    %83 = vector.load %arg4[%c0_71, %c0_72, %c5_73, %c0_74, %c0_75] : memref<1x1x12x8x128xf32, #tpu.memory_space<vmem>>, vector<1x1x1x1x128xf32>
    %84 = vector.shape_cast %83 : vector<1x1x1x1x128xf32> to vector<1x128xf32>
    %85 = vector.shape_cast %82 : vector<1x128xf32> to vector<1x1x1x1x128xf32>
    tpu.vector_store %arg4[%c0_71, %c0_72, %c5_73, %c0_74, %c0_75], %85 {strides = array<i32>} : memref<1x1x12x8x128xf32, #tpu.memory_space<vmem>>, vector<1x1x1x1x128xf32>,
    %c0_76 = arith.constant 0 : index
    %c0_77 = arith.constant 0 : index
    %c9 = arith.constant 9 : index
    %c0_78 = arith.constant 0 : index
    %c0_79 = arith.constant 0 : index
    %86 = vector.load %arg4[%c0_76, %c0_77, %c9, %c0_78, %c0_79] : memref<1x1x12x8x128xf32, #tpu.memory_space<vmem>>, vector<1x1x1x1x128xf32>
    %87 = vector.shape_cast %86 : vector<1x1x1x1x128xf32> to vector<1x128xf32>
    %88 = arith.extui %64 : vector<2x128xi1> to vector<2x128xi32>
    %89 = arith.sitofp %88 : vector<2x128xi32> to vector<2x128xf32>
    %cst_80 = arith.constant dense<0.000000e+00> : vector<128xf32>
    %90 = vector.multi_reduction <add>, %89, %cst_80 [0] : vector<2x128xf32> to vector<128xf32>
    %91 = vector.shape_cast %90 : vector<128xf32> to vector<1x128xf32>
    %92 = arith.addf %87, %91 : vector<1x128xf32>
    %c0_81 = arith.constant 0 : index
    %c0_82 = arith.constant 0 : index
    %c9_83 = arith.constant 9 : index
    %c0_84 = arith.constant 0 : index
    %c0_85 = arith.constant 0 : index
    %93 = vector.load %arg4[%c0_81, %c0_82, %c9_83, %c0_84, %c0_85] : memref<1x1x12x8x128xf32, #tpu.memory_space<vmem>>, vector<1x1x1x1x128xf32>
    %94 = vector.shape_cast %93 : vector<1x1x1x1x128xf32> to vector<1x128xf32>
    %95 = vector.shape_cast %92 : vector<1x128xf32> to vector<1x1x1x1x128xf32>
    tpu.vector_store %arg4[%c0_81, %c0_82, %c9_83, %c0_84, %c0_85], %95 {strides = array<i32>} : memref<1x1x12x8x128xf32, #tpu.memory_space<vmem>>, vector<1x1x1x1x128xf32>,
    %c2_i32_86 = arith.constant 2 : i32
    %96 = vector.broadcast %c2_i32_86 : i32 to vector<2x128xi32>
    %97 = arith.cmpi eq, %25, %96 : vector<2x128xi32>
    %c2_i32_87 = arith.constant 2 : i32
    %98 = vector.broadcast %c2_i32_87 : i32 to vector<2x128xi32>
    %99 = arith.cmpi eq, %5, %98 : vector<2x128xi32>
    %100 = arith.andi %97, %99 : vector<2x128xi1>
    %c0_88 = arith.constant 0 : index
    %c0_89 = arith.constant 0 : index
    %c2_90 = arith.constant 2 : index
    %c0_91 = arith.constant 0 : index
    %c0_92 = arith.constant 0 : index
    %101 = vector.load %arg4[%c0_88, %c0_89, %c2_90, %c0_91, %c0_92] : memref<1x1x12x8x128xf32, #tpu.memory_space<vmem>>, vector<1x1x1x1x128xf32>
    %102 = vector.shape_cast %101 : vector<1x1x1x1x128xf32> to vector<1x128xf32>
    %103 = arith.extui %100 : vector<2x128xi1> to vector<2x128xi32>
    %104 = arith.sitofp %103 : vector<2x128xi32> to vector<2x128xf32>
    %cst_93 = arith.constant dense<0.000000e+00> : vector<128xf32>
    %105 = vector.multi_reduction <add>, %104, %cst_93 [0] : vector<2x128xf32> to vector<128xf32>
    %106 = vector.shape_cast %105 : vector<128xf32> to vector<1x128xf32>
    %107 = arith.addf %102, %106 : vector<1x128xf32>
    %c0_94 = arith.constant 0 : index
    %c0_95 = arith.constant 0 : index
    %c2_96 = arith.constant 2 : index
    %c0_97 = arith.constant 0 : index
    %c0_98 = arith.constant 0 : index
    %108 = vector.load %arg4[%c0_94, %c0_95, %c2_96, %c0_97, %c0_98] : memref<1x1x12x8x128xf32, #tpu.memory_space<vmem>>, vector<1x1x1x1x128xf32>
    %109 = vector.shape_cast %108 : vector<1x1x1x1x128xf32> to vector<1x128xf32>
    %110 = vector.shape_cast %107 : vector<1x128xf32> to vector<1x1x1x1x128xf32>
    tpu.vector_store %arg4[%c0_94, %c0_95, %c2_96, %c0_97, %c0_98], %110 {strides = array<i32>} : memref<1x1x12x8x128xf32, #tpu.memory_space<vmem>>, vector<1x1x1x1x128xf32>,
    %c0_99 = arith.constant 0 : index
    %c0_100 = arith.constant 0 : index
    %c6 = arith.constant 6 : index
    %c0_101 = arith.constant 0 : index
    %c0_102 = arith.constant 0 : index
    %111 = vector.load %arg4[%c0_99, %c0_100, %c6, %c0_101, %c0_102] : memref<1x1x12x8x128xf32, #tpu.memory_space<vmem>>, vector<1x1x1x1x128xf32>
    %112 = vector.shape_cast %111 : vector<1x1x1x1x128xf32> to vector<1x128xf32>
    %113 = arith.extui %97 : vector<2x128xi1> to vector<2x128xi32>
    %114 = arith.sitofp %113 : vector<2x128xi32> to vector<2x128xf32>
    %cst_103 = arith.constant dense<0.000000e+00> : vector<128xf32>
    %115 = vector.multi_reduction <add>, %114, %cst_103 [0] : vector<2x128xf32> to vector<128xf32>
    %116 = vector.shape_cast %115 : vector<128xf32> to vector<1x128xf32>
    %117 = arith.addf %112, %116 : vector<1x128xf32>
    %c0_104 = arith.constant 0 : index
    %c0_105 = arith.constant 0 : index
    %c6_106 = arith.constant 6 : index
    %c0_107 = arith.constant 0 : index
    %c0_108 = arith.constant 0 : index
    %118 = vector.load %arg4[%c0_104, %c0_105, %c6_106, %c0_107, %c0_108] : memref<1x1x12x8x128xf32, #tpu.memory_space<vmem>>, vector<1x1x1x1x128xf32>
    %119 = vector.shape_cast %118 : vector<1x1x1x1x128xf32> to vector<1x128xf32>
    %120 = vector.shape_cast %117 : vector<1x128xf32> to vector<1x1x1x1x128xf32>
    tpu.vector_store %arg4[%c0_104, %c0_105, %c6_106, %c0_107, %c0_108], %120 {strides = array<i32>} : memref<1x1x12x8x128xf32, #tpu.memory_space<vmem>>, vector<1x1x1x1x128xf32>,
    %c0_109 = arith.constant 0 : index
    %c0_110 = arith.constant 0 : index
    %c10 = arith.constant 10 : index
    %c0_111 = arith.constant 0 : index
    %c0_112 = arith.constant 0 : index
    %121 = vector.load %arg4[%c0_109, %c0_110, %c10, %c0_111, %c0_112] : memref<1x1x12x8x128xf32, #tpu.memory_space<vmem>>, vector<1x1x1x1x128xf32>
    %122 = vector.shape_cast %121 : vector<1x1x1x1x128xf32> to vector<1x128xf32>
    %123 = arith.extui %99 : vector<2x128xi1> to vector<2x128xi32>
    %124 = arith.sitofp %123 : vector<2x128xi32> to vector<2x128xf32>
    %cst_113 = arith.constant dense<0.000000e+00> : vector<128xf32>
    %125 = vector.multi_reduction <add>, %124, %cst_113 [0] : vector<2x128xf32> to vector<128xf32>
    %126 = vector.shape_cast %125 : vector<128xf32> to vector<1x128xf32>
    %127 = arith.addf %122, %126 : vector<1x128xf32>
    %c0_114 = arith.constant 0 : index
    %c0_115 = arith.constant 0 : index
    %c10_116 = arith.constant 10 : index
    %c0_117 = arith.constant 0 : index
    %c0_118 = arith.constant 0 : index
    %128 = vector.load %arg4[%c0_114, %c0_115, %c10_116, %c0_117, %c0_118] : memref<1x1x12x8x128xf32, #tpu.memory_space<vmem>>, vector<1x1x1x1x128xf32>
    %129 = vector.shape_cast %128 : vector<1x1x1x1x128xf32> to vector<1x128xf32>
    %130 = vector.shape_cast %127 : vector<1x128xf32> to vector<1x1x1x1x128xf32>
    tpu.vector_store %arg4[%c0_114, %c0_115, %c10_116, %c0_117, %c0_118], %130 {strides = array<i32>} : memref<1x1x12x8x128xf32, #tpu.memory_space<vmem>>, vector<1x1x1x1x128xf32>,
    %c3_i32_119 = arith.constant 3 : i32
    %131 = vector.broadcast %c3_i32_119 : i32 to vector<2x128xi32>
    %132 = arith.cmpi eq, %25, %131 : vector<2x128xi32>
    %c3_i32_120 = arith.constant 3 : i32
    %133 = vector.broadcast %c3_i32_120 : i32 to vector<2x128xi32>
    %134 = arith.cmpi eq, %5, %133 : vector<2x128xi32>
    %135 = arith.andi %132, %134 : vector<2x128xi1>
    %c0_121 = arith.constant 0 : index
    %c0_122 = arith.constant 0 : index
    %c3_123 = arith.constant 3 : index
    %c0_124 = arith.constant 0 : index
    %c0_125 = arith.constant 0 : index
    %136 = vector.load %arg4[%c0_121, %c0_122, %c3_123, %c0_124, %c0_125] : memref<1x1x12x8x128xf32, #tpu.memory_space<vmem>>, vector<1x1x1x1x128xf32>
    %137 = vector.shape_cast %136 : vector<1x1x1x1x128xf32> to vector<1x128xf32>
    %138 = arith.extui %135 : vector<2x128xi1> to vector<2x128xi32>
    %139 = arith.sitofp %138 : vector<2x128xi32> to vector<2x128xf32>
    %cst_126 = arith.constant dense<0.000000e+00> : vector<128xf32>
    %140 = vector.multi_reduction <add>, %139, %cst_126 [0] : vector<2x128xf32> to vector<128xf32>
    %141 = vector.shape_cast %140 : vector<128xf32> to vector<1x128xf32>
    %142 = arith.addf %137, %141 : vector<1x128xf32>
    %c0_127 = arith.constant 0 : index
    %c0_128 = arith.constant 0 : index
    %c3_129 = arith.constant 3 : index
    %c0_130 = arith.constant 0 : index
    %c0_131 = arith.constant 0 : index
    %143 = vector.load %arg4[%c0_127, %c0_128, %c3_129, %c0_130, %c0_131] : memref<1x1x12x8x128xf32, #tpu.memory_space<vmem>>, vector<1x1x1x1x128xf32>
    %144 = vector.shape_cast %143 : vector<1x1x1x1x128xf32> to vector<1x128xf32>
    %145 = vector.shape_cast %142 : vector<1x128xf32> to vector<1x1x1x1x128xf32>
    tpu.vector_store %arg4[%c0_127, %c0_128, %c3_129, %c0_130, %c0_131], %145 {strides = array<i32>} : memref<1x1x12x8x128xf32, #tpu.memory_space<vmem>>, vector<1x1x1x1x128xf32>,
    %c0_132 = arith.constant 0 : index
    %c0_133 = arith.constant 0 : index
    %c11 = arith.constant 11 : index
    %c0_134 = arith.constant 0 : index
    %c0_135 = arith.constant 0 : index
    %146 = vector.load %arg4[%c0_132, %c0_133, %c11, %c0_134, %c0_135] : memref<1x1x12x8x128xf32, #tpu.memory_space<vmem>>, vector<1x1x1x1x128xf32>
    %147 = vector.shape_cast %146 : vector<1x1x1x1x128xf32> to vector<1x128xf32>
    %148 = arith.extui %134 : vector<2x128xi1> to vector<2x128xi32>
    %149 = arith.sitofp %148 : vector<2x128xi32> to vector<2x128xf32>
    %cst_136 = arith.constant dense<0.000000e+00> : vector<128xf32>
    %150 = vector.multi_reduction <add>, %149, %cst_136 [0] : vector<2x128xf32> to vector<128xf32>
    %151 = vector.shape_cast %150 : vector<128xf32> to vector<1x128xf32>
    %152 = arith.addf %147, %151 : vector<1x128xf32>
    %c0_137 = arith.constant 0 : index
    %c0_138 = arith.constant 0 : index
    %c11_139 = arith.constant 11 : index
    %c0_140 = arith.constant 0 : index
    %c0_141 = arith.constant 0 : index
    %153 = vector.load %arg4[%c0_137, %c0_138, %c11_139, %c0_140, %c0_141] : memref<1x1x12x8x128xf32, #tpu.memory_space<vmem>>, vector<1x1x1x1x128xf32>
    %154 = vector.shape_cast %153 : vector<1x1x1x1x128xf32> to vector<1x128xf32>
    %155 = vector.shape_cast %152 : vector<1x128xf32> to vector<1x1x1x1x128xf32>
    tpu.vector_store %arg4[%c0_137, %c0_138, %c11_139, %c0_140, %c0_141], %155 {strides = array<i32>} : memref<1x1x12x8x128xf32, #tpu.memory_space<vmem>>, vector<1x1x1x1x128xf32>,
    return
  }
  func.func @transform_0(%arg0: i32, %arg1: i32) -> (i32, i32, i32, i32) {
    %c0_i32 = arith.constant 0 : i32
    %c0_i32_0 = arith.constant 0 : i32
    %c0_i32_1 = arith.constant 0 : i32
    return %arg0, %c0_i32, %arg1, %c0_i32_0 : i32, i32, i32, i32
  }
  func.func @transform_1(%arg0: i32, %arg1: i32) -> (i32, i32, i32) {
    %c0_i32 = arith.constant 0 : i32
    %c0_i32_0 = arith.constant 0 : i32
    return %arg0, %arg1, %c0_i32 : i32, i32, i32
  }
  func.func @transform_2(%arg0: i32, %arg1: i32) -> (i32, i32, i32, i32, i32) {
    %c0_i32 = arith.constant 0 : i32
    %c0_i32_0 = arith.constant 0 : i32
    %c0_i32_1 = arith.constant 0 : i32
    %c0_i32_2 = arith.constant 0 : i32
    return %arg0, %arg1, %c0_i32, %c0_i32_0, %c0_i32_1 : i32, i32, i32, i32, i32
  }
}

</mosaic_0001>

<bundles_post_ra>
// kernel: tpu_custom_call.1
= control target key start
LH: loop header
LB: loop body
LE: loop exit
PB: predicated region body
PF: predicated region fallthrough
CT: control target
= control target key end

     0   :  { %7 = vsyncpa [#allocation3], 0  ;;  %s1079_s0 = inlined_call_operand.hbm [shape: f32[2,4,2,128], index: 0, kind: input, shape index: {}]   ;;  %s1080_s1 = inlined_call_operand.hbm [shape: s32[2,2,128], index: 1, kind: input, shape index: {}]   ;;  %s1081_s2 = inlined_call_operand.hbm [shape: f32[2,1,12,8,128], index: 2, kind: output, shape index: {}]  }
   0x1   :  { %9 = vsyncpa [#allocation3 + $0x1], 0 }
   0x2   :  { %10 = vsyncpa [#allocation6], 0 }
   0x3   :  { %12 = vsyncpa [#allocation6 + $0x1], 0 }
   0x4   :  { %13 = vsyncpa [#allocation4], 0 }
   0x5   :  { %15 = vsyncpa [#allocation4 + $0x1], 0  ;;  %s828_s9 = smov 0   ;;  %s830_s10 = smov 0  }
   0x6   :  { %s832_s11 = smov 0   ;;  %s834_s12 = smov 0  }
   0x7   :  { %s836_s13 = smov 0   ;;  %s838_s14 = smov 0  }
   0x8 LB: > { %s534_s15 = sadd.s32 4294967295, %s805_s14   ;;  %s535_s16 = sadd.s32 4294967294, %s805_s14   ;;  %s805_s14 = sphi %s838_s14, %s21_s14   ;;  %s801_s13 = sphi %s836_s13, %s1091_s13   ;;  %s797_s12 = sphi %s834_s12, %s1090_s12   ;;  %s793_s11 = sphi %s832_s11, %s1089_s11   ;;  %s789_s10 = sphi %s830_s10, %s1088_s10   ;;  %s785_s9 = sphi %s828_s9, %s1087_s9  }
   0x9   : > { %s33_s17 = sadd.s32 1, %s801_s13  ;;  %s42_s18 = sadd.s32 1, %s793_s11 }
   0xa   : > { %p35_p0 = scmp.ge.s32.totalorder %s33_s17, 2  ;;  %p49_p1 = scmp.ne.s32.totalorder %s793_s11, %s789_s10 }
   0xb   : > { %p50_p2 = scmp.eq.s32.totalorder %s805_s14, 0  ;;  %p55_p3 = scmp.ne.s32.totalorder %s789_s10, %s785_s9 }
   0xc   : > { %s1093_s17 = smov (%p35_p0, %s33_s17), 0  ;;  %p56_p5 = scmp.eq.s32.totalorder %s534_s15, 0 }
   0xd   : > { %p869_p4 = por %p50_p2, %p49_p1  ;;  %s37_s20 = ssub.s32 %s801_s13, %s1093_s17 }
   0xe   : > { %p109_p6 = scmp.eq.s32.totalorder %s534_s15, 1  ;;  %p40_p7 = scmp.eq.s32.totalorder %s37_s20, 0 }
   0xf   : > { %p875_p8 = por %p56_p5, %p55_p3  ;;  %p115_p10 = scmp.eq.s32.totalorder %s535_s16, 1 }
  0x10   : > { %p879_p9 = por %p109_p6, %p49_p1  ;;  %p537_p12 = scmp.ge.s32.totalorder %s805_s14, 2 }
  0x11   : > { %s884_s23 = scalar_select %p40_p7, %s793_s11, %s42_s18  }
  0x12   : > { %p886_p11 = por %p115_p10, %p55_p3  ;;  %p603_p13 = scmp.lt.s32.totalorder %s805_s14, 2 }
  0x13   : > { %s135_s25 = sand.u32 1, %s793_s11   ;;  %s583_s27 = sshll.u32 %s801_s13, 3 }
  0x14   : > { %s538_s26 = sshll.u32 %s135_s25, 3  ;;  %s145_s30 = scalar_lea.hbm %s1079_s0, %s583_s27 }
  0x15   : > { %s139_s3 = scalar_lea.vmem [#allocation2], %s538_s26  ;;  %s146_s5 = sshll.u32 %s145_s30, 4  ;;  %s147_s5 = int_to_ptr.hbm [resolvable:$true] %s146_s5 }
  0x16   : > { %s148_s4 = sshll.u32 %s139_s3, 4  ;;  %p899_p0 = pnand %p603_p13, %p869_p4  ;;  %s149_s4 = int_to_ptr.vmem [resolvable:$true] %s148_s4 }
  0x17   : > { %p543_p1 = scmp.ge.s32.totalorder %s805_s14, 1  ;;  %s136_s7 = scalar_lea.sflag [#allocation3], %s135_s25 }
  0x18   : > { %s807_s8 = smov 32   ;;  %s808_s15 = smov 2  }
  0x19   : > { %595 = dma.hbm_to_vmem [thread:$0]  (!%p899_p0), %s147_s5, 128, %s149_s4, %s136_s7, %s807_s8, %s807_s8, %s808_s15  }
  0x1a   : > { %p176_p2 = scmp.lt.s32.totalorder %s805_s14, 3  ;;  %s541_s16 = sshll.u32 %s135_s25, 1 }
  0x1b   : > { %s542_s18 = sshll.u32 %s801_s13, 1  ;;  %s162_s27 = scalar_lea.vmem [#allocation5], %s541_s16 }
  0x1c   : > { %p177_p3 = pnand %p543_p1, %p176_p2  ;;  %s167_s19 = scalar_lea.hbm %s1080_s1, %s542_s18 }
  0x1d   : > { %s171_s28 = sshll.u32 %s162_s27, 4  ;;  %s169_s29 = sshll.u32 %s167_s19, 4  ;;  %s172_s28 = int_to_ptr.vmem [resolvable:$true] %s171_s28  ;;  %s170_s29 = int_to_ptr.hbm [resolvable:$true] %s169_s29 }
  0x1e   : > { %s159_s30 = scalar_lea.sflag [#allocation6], %s135_s25  ;;  %180 = sbr.rel (%p177_p3) target bundleno = 84 (0x54), region = 28 }
  0x1f   : > { %598 = dma.hbm_to_vmem [thread:$0]  (!%p899_p0), %s170_s29, 32, %s172_s28, %s159_s30  }
  0x20   : > { %s914_s3 = sand.u32 (!%p177_p3), 1, %s789_s10  }
  0x21   : > { %s544_s4 = sshll.u32 (!%p177_p3), %s914_s3, 3  ;;  %s183_s5 = scalar_lea.sflag (!%p177_p3), [#allocation3], %s914_s3 }
  0x22   : > { %s918_s7 = scalar_lea.vmem (!%p177_p3), [#allocation2], %s544_s4 }
  0x23   : > { %772 = dma.done.wait (%p875_p8), %s183_s5, 128  }
  0x24   : > { %774 = vsyncadd (%p875_p8), %s183_s5, 4294967168  ;;  %s545_s25 = sshll.u32 %s914_s3, 1  ;;  %s193_s6 = scalar_lea.sflag [#allocation6], %s914_s3 }
  0x25   : > { %s196_s8 = scalar_lea.vmem [#allocation5], %s545_s25 }
  0x26   : > { %776 = dma.done.wait (%p875_p8), %s193_s6, 32  }
  0x27   : > { %778 = vsyncadd (%p875_p8), %s193_s6, 4294967264  ;;  %s584_s15 = smul.u32 96, %s914_s3  ;;  %v809_v0 = vmov 0.0   ;;  %v943_v1 = vld [vmem:[%s196_s8] sm:$0x3]  ;;  %vm257_vm0 = vcmask 1041408  }
  0x28   : > { %v236_v2 = vld [vmem:[%s918_s7] sm:$0x3]  ;;  %v546_v3 = vld [vmem:[%s918_s7 + $0x2] sm:$0x3]  ;;  %v547_v4 = vld [vmem:[%s918_s7 + $0x4] sm:$0x3] }
  0x29   : > { %s931_s16 = scalar_lea.vmem [#allocation7], %s584_s15  ;;  %vm252_vm1 = vcmp.eq.s32.totalorder %v943_v1, 0  ;;  %vm239_vm2 = vcmp.gt.f32.partialorder %v546_v3, %v236_v2  ;;  %vm294_vm3 = vcmp.eq.s32.totalorder %v943_v1, 1  ;;  %vm336_vm4 = vcmp.eq.s32.totalorder %v943_v1, 2  ;;  %v548_v9 = vld [vmem:[%s918_s7 + $0x6] sm:$0x3] }
  0x2a   : > { %223 = vst [vmem:[%s931_s16] sm:$0xff] %v809_v0  ;;  %v554_v5 = vsel %vm252_vm1, 1.0, %v809_v0  ;;  %v240_v6 = vsel %vm239_vm2, %v546_v3, %v236_v2  ;;  %v810_v7 = vmov 0   ;;  %v563_v11 = vsel %vm294_vm3, 1.0, %v809_v0  ;;  %s585_s21 = smul.u32 96, %s797_s12  ;;  %s421_s12 = sshll.u32 %s931_s16, 4  ;;  %s422_s12 = int_to_ptr.vmem [resolvable:$true] %s421_s12 }
  0x2b   : > { %224 = vst [vmem:[%s931_s16 + $0x8] sm:$0xff] %v809_v0  ;;  %v241_v8 = vsel %vm239_vm2, 1, %v810_v7  ;;  %v284_v10 = vsel %vm257_vm0, %v554_v5, 0.0  ;;  %vm244_vm5 = vcmp.gt.f32.partialorder %v547_v4, %v240_v6  ;;  %v326_v13 = vsel %vm257_vm0, %v563_v11, 0.0  ;;  %s407_s27 = scalar_lea.sflag [#allocation4], %s914_s3  ;;  %s739_s5 = scalar_lea.hbm %s1081_s2, 192 }
  0x2c   : > { %225 = vst [vmem:[%s931_s16 + $0x10] sm:$0xff] %v809_v0  ;;  %v285_v12 = vrot.slane %v284_v10, 4  ;;  %v572_v14 = vsel %vm336_vm4, 1.0, %v809_v0  ;;  %v245_v15 = vsel %vm244_vm5, %v547_v4, %v240_v6  ;;  %v246_v16 = vsel %vm244_vm5, 2, %v241_v8  ;;  %s420_s26 = scalar_lea.hbm %s1081_s2, %s585_s21 }
  0x2d   : > { %226 = vst [vmem:[%s931_s16 + $0x18] sm:$0xff] %v809_v0  ;;  %v327_v17 = vrot.slane %v326_v13, 4  ;;  %v368_v18 = vsel %vm257_vm0, %v572_v14, 0.0  ;;  %vm249_vm6 = vcmp.gt.f32.partialorder %v548_v9, %v245_v15  ;;  %vm378_vm7 = vcmp.eq.s32.totalorder %v943_v1, 3  ;;  %s423_s19 = sshll.u32 %s420_s26, 4  ;;  %s424_s19 = int_to_ptr.hbm [resolvable:$true] %s423_s19 }
  0x2e   : > { %227 = vst [vmem:[%s931_s16 + $0x20] sm:$0xff] %v809_v0  ;;  %v286_v19 = vadd.f32 %v285_v12, %v284_v10  ;;  %v979_v20 = vsel %vm249_vm6, 3, %v246_v16  ;;  %v369_v22 = vrot.slane %v368_v18, 4  ;;  %v984_v23 = vsel %vm378_vm7, 1.0, %v809_v0  ;;  %s733_s28 = sshra.s32 %s424_s19, 4  ;;  %s734_s28 = int_to_ptr.hbm [resolvable:$true] %s733_s28 }
  0x2f   : > { %228 = vst [vmem:[%s931_s16 + $0x28] sm:$0xff] %v809_v0  ;;  %v328_v21 = vadd.f32 %v327_v17, %v326_v13  ;;  %vm251_vm8 = vcmp.eq.s32.totalorder %v979_v20, 0  ;;  %vm293_vm9 = vcmp.eq.s32.totalorder %v979_v20, 1  ;;  %vm335_vm10 = vcmp.eq.s32.totalorder %v979_v20, 2  ;;  %s735_s29 = scalar_lea.hbm %s734_s28, 96  ;;  %p740_p7 = scmp.lt.s32.totalorder %s734_s28, %s1081_s2 }
  0x30   : > { %229 = vst [vmem:[%s931_s16 + $0x30] sm:$0xff] %v809_v0  ;;  %v287_v24 = vrot.slane %v286_v19, 2  ;;  %vm253_vm11 = vmand %vm251_vm8, %vm252_vm1  ;;  %v551_v25 = vsel %vm251_vm8, 1.0, %v809_v0  ;;  %v560_v26 = vsel %vm293_vm9, 1.0, %v809_v0  ;;  %v569_v28 = vsel %vm335_vm10, 1.0, %v809_v0  ;;  %p736_p4 = scmp.ne.s32.totalorder %s734_s28, %s735_s29  ;;  %p741_p8 = scmp.lt.s32.totalorder %s739_s5, %s735_s29 }
  0x31   : > { %230 = vst [vmem:[%s931_s16 + $0x38] sm:$0xff] %v809_v0  ;;  %v329_v27 = vrot.slane %v328_v21, 2  ;;  %v549_v29 = vsel %vm253_vm11, 1.0, %v809_v0  ;;  %v271_v30 = vsel %vm257_vm0, %v551_v25, 0.0  ;;  %vm295_vm12 = vmand %vm293_vm9, %vm294_vm3  ;;  %v313_v32 = vsel %vm257_vm0, %v560_v26, 0.0 }
  0x32   : > { %231 = vst [vmem:[%s931_s16 + $0x40] sm:$0xff] %v809_v0  ;;  %v288_v31 = vadd.f32 %v287_v24, %v286_v19  ;;  %v258_v33 = vsel %vm257_vm0, %v549_v29, 0.0  ;;  %v272_v34 = vrot.slane %v271_v30, 4  ;;  %v557_v35 = vsel %vm295_vm12, 1.0, %v809_v0  ;;  %vm337_vm13 = vmand %vm335_vm10, %vm336_vm4  ;;  %v254_v14 = vld [vmem:[%s931_s16] sm:$0x1]  ;;  %p737_p5 = pnand %p736_p4, %p879_p9  ;;  %p742_p10 = por %p741_p8, %p740_p7 }
  0x33   : > { %232 = vst [vmem:[%s931_s16 + $0x48] sm:$0xff] %v809_v0  ;;  %v314_v36 = vrot.slane %v313_v32, 4  ;;  %v259_v37 = vrot.slane %v258_v33, 4  ;;  %v300_v39 = vsel %vm257_vm0, %v557_v35, 0.0  ;;  %v330_v40 = vadd.f32 %v329_v27, %v328_v21  ;;  %v556_v21 = vld [vmem:[%s931_s16 + $0x8] sm:$0x1] }
  0x34   : > { %233 = vst [vmem:[%s931_s16 + $0x50] sm:$0xff] %v809_v0  ;;  %v289_v38 = vrot.slane %v288_v31, 1  ;;  %v273_v41 = vadd.f32 %v272_v34, %v271_v30  ;;  %v301_v43 = vrot.slane %v300_v39, 4  ;;  %v566_v45 = vsel %vm337_vm13, 1.0, %v809_v0  ;;  %v565_v30 = vld [vmem:[%s931_s16 + $0x10] sm:$0x1]  ;;  %p738_p6 = pneg %p737_p5 }
  0x35   : > { %234 = vst [vmem:[%s931_s16 + $0x58] sm:$0xff] %v809_v0  ;;  %v315_v44 = vadd.f32 %v314_v36, %v313_v32  ;;  %v260_v46 = vadd.f32 %v259_v37, %v258_v33  ;;  %v331_v48 = vrot.slane %v330_v40, 1  ;;  %v342_v49 = vsel %vm257_vm0, %v566_v45, 0.0  ;;  %v550_v2 = vld [vmem:[%s931_s16 + $0x20] sm:$0x1] }
  0x36   : > { %v290_v47 = vadd.f32 %v289_v38, %v288_v31  ;;  %v274_v50 = vrot.slane %v273_v41, 2  ;;  %v302_v51 = vadd.f32 %v301_v43, %v300_v39  ;;  %v343_v54 = vrot.slane %v342_v49, 4  ;;  %v559_v8 = vld [vmem:[%s931_s16 + $0x28] sm:$0x1]  ;;  %p743_p13 = pnand %p742_p10, %p738_p6 }
  0x37   : > { %v316_v52 = vrot.slane %v315_v44, 2  ;;  %v261_v55 = vrot.slane %v260_v46, 2  ;;  %v332_v57 = vadd.f32 %v331_v48, %v330_v40  ;;  %v355_v58 = vsel %vm257_vm0, %v569_v28, 0.0 }
  0x38   : > { %v275_v59 = vadd.f32 %v274_v50, %v273_v41  ;;  %v303_v60 = vrot.slane %v302_v51, 2  ;;  %v344_v62 = vadd.f32 %v343_v54, %v342_v49  ;;  %v356_v4 = vrot.slane %v355_v58, 4  ;;  %v568_v41 = vld [vmem:[%s931_s16 + $0x30] sm:$0x1] }
  0x39   : > { %v553_v42 = vld [vmem:[%s931_s16 + $0x40] sm:$0x1]  ;;  %v317_v61 = vadd.f32 %v316_v52, %v315_v44  ;;  %v262_v63 = vadd.f32 %v261_v55, %v260_v46  ;;  %v370_v5 = vadd.f32 %v369_v22, %v368_v18  ;;  %vm377_vm14 = vcmp.eq.s32.totalorder %v979_v20, 3 }
  0x3a   : > { %v562_v53 = vld [vmem:[%s931_s16 + $0x48] sm:$0x1]  ;;  %v291_v56 = vadd.f32 %v553_v42, %v290_v47  ;;  %v276_v6 = vrot.slane %v275_v59, 1  ;;  %v304_v7 = vadd.f32 %v303_v60, %v302_v51  ;;  %v345_v10 = vrot.slane %v344_v62, 2  ;;  %vm379_vm15 = vmand %vm377_vm14, %vm378_vm7  ;;  %v574_v51 = vld [vmem:[%s931_s16 + $0x18] sm:$0x1] }
  0x3b   : > { %v333_v3 = vadd.f32 %v562_v53, %v332_v57  ;;  %v318_v9 = vrot.slane %v317_v61, 1  ;;  %v263_v11 = vrot.slane %v262_v63, 1  ;;  %v357_v12 = vadd.f32 %v356_v4, %v355_v58  ;;  %v571_v35 = vld [vmem:[%s931_s16 + $0x50] sm:$0x1] }
  0x3c   : > { %555 = vst [vmem:[%s931_s16 + $0x40] sm:$0x1] %v291_v56  ;;  %v371_v13 = vrot.slane %v370_v5, 2  ;;  %v277_v15 = vadd.f32 %v276_v6, %v275_v59  ;;  %v305_v16 = vrot.slane %v304_v7, 1  ;;  %v346_v19 = vadd.f32 %v345_v10, %v344_v62  ;;  %v577_v54 = vld [vmem:[%s931_s16 + $0x58] sm:$0x1] }
  0x3d   : > { %564 = vst [vmem:[%s931_s16 + $0x48] sm:$0x1] %v333_v3  ;;  %v319_v17 = vadd.f32 %v318_v9, %v317_v61  ;;  %v264_v18 = vadd.f32 %v263_v11, %v262_v63  ;;  %v358_v22 = vrot.slane %v357_v12, 2  ;;  %v575_v25 = vsel %vm379_vm15, 1.0, %v809_v0 }
  0x3e   : > { %v372_v24 = vadd.f32 %v371_v13, %v370_v5  ;;  %v278_v26 = vadd.f32 %v550_v2, %v277_v15  ;;  %v306_v20 = vadd.f32 %v305_v16, %v304_v7  ;;  %v347_v28 = vrot.slane %v346_v19, 1 }
  0x3f   : > { %v320_v27 = vadd.f32 %v559_v8, %v319_v17  ;;  %v265_v29 = vadd.f32 %v264_v18, %v254_v14  ;;  %v359_v31 = vadd.f32 %v358_v22, %v357_v12  ;;  %v384_v32 = vsel %vm257_vm0, %v575_v25, 0.0 }
  0x40   : > { %v373_v1 = vrot.slane %v372_v24, 1  ;;  %552 = vst [vmem:[%s931_s16 + $0x20] sm:$0x1] %v278_v26  ;;  %v307_v33 = vadd.f32 %v556_v21, %v306_v20  ;;  %v348_v34 = vadd.f32 %v347_v28, %v346_v19  ;;  %v385_v0 = vrot.slane %v384_v32, 4 }
  0x41   : > { %v397_v36 = vsel %vm257_vm0, %v984_v23, 0.0  ;;  %266 = vst [vmem:[%s931_s16] sm:$0x1] %v265_v29  ;;  %v360_v37 = vrot.slane %v359_v31, 1 }
  0x42   : > { %v374_v38 = vadd.f32 %v373_v1, %v372_v24  ;;  %v398_v39 = vrot.slane %v397_v36, 4  ;;  %558 = vst [vmem:[%s931_s16 + $0x8] sm:$0x1] %v307_v33  ;;  %v349_v40 = vadd.f32 %v565_v30, %v348_v34  ;;  %v386_v42 = vadd.f32 %v385_v0, %v384_v32 }
  0x43   : > { %561 = vst [vmem:[%s931_s16 + $0x28] sm:$0x1] %v320_v27  ;;  %v361_v43 = vadd.f32 %v360_v37, %v359_v31 }
  0x44   : > { %v375_v44 = vadd.f32 %v571_v35, %v374_v38  ;;  %v399_v45 = vadd.f32 %v398_v39, %v397_v36  ;;  %567 = vst [vmem:[%s931_s16 + $0x10] sm:$0x1] %v349_v40  ;;  %v387_v23 = vrot.slane %v386_v42, 2 }
  0x45   : > { %v362_v46 = vadd.f32 %v568_v41, %v361_v43 }
  0x46   : > { %573 = vst [vmem:[%s931_s16 + $0x50] sm:$0x1] %v375_v44  ;;  %v400_v47 = vrot.slane %v399_v45, 2  ;;  %v388_v48 = vadd.f32 %v387_v23, %v386_v42 }
  0x47   : > { %570 = vst [vmem:[%s931_s16 + $0x30] sm:$0x1] %v362_v46 }
  0x48   : > { %v401_v49 = vadd.f32 %v400_v47, %v399_v45  ;;  %v389_v50 = vrot.slane %v388_v48, 1 }
  0x4a   : > { %v402_v52 = vrot.slane %v401_v49, 1  ;;  %v390_v53 = vadd.f32 %v389_v50, %v388_v48 }
  0x4c   : > { %v403_v55 = vadd.f32 %v402_v52, %v401_v49  ;;  %v391_v56 = vadd.f32 %v574_v51, %v390_v53 }
  0x4e   : > { %v404_v57 = vadd.f32 %v577_v54, %v403_v55  ;;  %576 = vst [vmem:[%s931_s16 + $0x18] sm:$0x1] %v391_v56 }
  0x50   : > { %579 = vst [vmem:[%s931_s16 + $0x58] sm:$0x1] %v404_v57 }
  0x51   : > { %746 = shalt.err (!%p743_p13)
}
  0x52   : > { %s811_s3 = smov 128   ;;  %s812_s6 = smov 8  }
  0x53   : > { %590 = dma.vmem_to_hbm [thread:$0]  (%p879_p9), %s422_s12, 1536, %s424_s19, %s407_s27, %s811_s3, %s811_s3, %s812_s6  }
  0x54 PF: > { %s438_s8 = sand.u32 1, %s785_s9   ;;  %p600_p0 = pnand %p537_p12, %p886_p11 }
  0x55   : > { %s439_s15 = scalar_lea.sflag [#allocation4], %s438_s8 }
  0x56   : > { %p601_p1 = pneg %p600_p0 }
  0x58   : > { %780 = dma.done.wait (%p601_p1), %s439_s15, 1536  }
  0x59   : > { %782 = vsyncadd (%p601_p1), %s439_s15, 4294965760  ;;  %s21_s14 = sadd.s32 1, %s805_s14   ;;  %s1087_s9 = smov %s789_s10 }
  0x5a   : > { %p18_p2 = scmp.ge.s32.totalorder %s21_s14, 4   ;;  %s1088_s10 = smov %s793_s11 }
  0x5b   : > { %s1089_s11 = smov %s884_s23  ;;  %s1090_s12 = smov %s801_s13 }
  0x5c   : > { %s1091_s13 = smov %s1093_s17  ;;  %20 = sbr.rel (!%p18_p2) target bundleno = 8 (0x8), region = 99 }
  0x61   :  { %445 = vsyncpa [#allocation3], 1 }
  0x62   :  { %447 = vsyncpa [#allocation3 + $0x1], 1 }
  0x63   :  { %448 = vsyncpa [#allocation6], 1 }
  0x64   :  { %450 = vsyncpa [#allocation6 + $0x1], 1 }
  0x65   :  { %451 = vsyncpa [#allocation4], 1 }
  0x66   :  { %453 = vsyncpa [#allocation4 + $0x1], 1 }

</bundles_post_ra>
